<compile_context>
chip_gen: v6e
topology: v6e:2x2x1
jax: 0.10.0
libtpu: 0.0.40
codegen_flags: <defaults>
</compile_context>

<pallas_src>
import jax
import jax.numpy as jnp
from jax import lax
from jax.experimental import pallas as pl
from jax.experimental.pallas import tpu as pltpu


def _round_up(x, m):
    return (x + m - 1) // m * m


def _feature_kernel(x_ref, w_ref, ws_ref, b_ref, xw_ref, xsb_ref):
    """Per node-tile: x_w = x@W (emitted bf16), x_self_b = x@W_self + bias (f32)."""
    x = x_ref[...]
    xw = jnp.dot(x, w_ref[...], preferred_element_type=jnp.float32)
    xs = jnp.dot(x, ws_ref[...], preferred_element_type=jnp.float32)
    xw_ref[...] = xw.astype(xw_ref.dtype)   # single bf16 cast, reused by all edge tiles
    xsb_ref[...] = xs + b_ref[...]


def _aggregate_kernel(src_ref, dst_ref, xw_ref, xsb_ref, out_ref):
    """Grid = (node tiles, edge tiles): gather + scatter-add as one-hot MXU matmuls."""
    i = pl.program_id(0)      # node/output tile axis -- "parallel"
    e = pl.program_id(1)      # edge tile axis (reduction) -- "arbitrary", last

    # Resident f32 output block doubles as the accumulator; seed it with the
    # self-message + bias so no separate finalize pass is needed.
    @pl.when(e == 0)
    def _init():
        out_ref[...] = xsb_ref[...]

    te = src_ref.shape[0]
    tn = out_ref.shape[0]
    n_pad = xw_ref.shape[0]

    # Source one-hot, (TE, Npad): row t selects node src[t].  Padded edges use
    # src = -1 and produce an all-zero row (contribute nothing).
    node_ids = lax.broadcasted_iota(jnp.int32, (te, n_pad), 1)
    src_oh = (src_ref[...] == node_ids).astype(jnp.bfloat16)

    # Gather: msg[t, :] = x_w[src[t], :]  (exact: exactly one 1.0 per row;
    # bf16 x bf16 products, f32 accumulation on the MXU).
    msg = jnp.dot(src_oh, xw_ref[...], preferred_element_type=jnp.float32)

    # Destination one-hot built directly in (TN, TE) orientation -- no
    # transpose on the critical path: dst_oh_t[n, t] = (dst[t] == i*TN + n).
    row_ids = lax.broadcasted_iota(jnp.int32, (tn, te), 0) + i * tn
    dst_oh_t = (dst_ref[...] == row_ids).astype(jnp.bfloat16)

    # Scatter-add into this node tile, accumulated in f32 in the resident block.
    out_ref[...] += jnp.dot(dst_oh_t, msg.astype(jnp.bfloat16),
                            preferred_element_type=jnp.float32)


def egeneral_conv(x, edge_index, weight, weight_self, bias, *,
                  block_n=128, block_e=256):
    """x: [N, Din] float; edge_index: [2, E] int; returns [N, Dout] float32."""
    n, din = x.shape
    dout = weight.shape[1]
    n_edges = edge_index.shape[1]

    tn = block_n
    te = block_e
    d_pad = _round_up(dout, 128)        # lane-dense output / full MXU columns
    n_pad = _round_up(n, tn)
    e_pad = _round_up(n_edges, te)

    x_pad = jnp.zeros((n_pad, din), jnp.float32).at[:n, :].set(x.astype(jnp.float32))
    w_pad = jnp.zeros((din, d_pad), jnp.float32).at[:, :dout].set(weight.astype(jnp.float32))
    ws_pad = jnp.zeros((din, d_pad), jnp.float32).at[:, :dout].set(weight_self.astype(jnp.float32))
    b_pad = jnp.zeros((1, d_pad), jnp.float32).at[0, :dout].set(bias.astype(jnp.float32))

    # dst lane-major (1, E) -> cheap lane-wise compare for the (TN, TE) one-hot.
    # src as an (E, 1) column -> the (TE, Npad) source one-hot compare broadcasts
    # along lanes with no relayout.  Padded edges get -1 (never match a node).
    src = jnp.full((e_pad, 1), -1, jnp.int32).at[:n_edges, 0].set(edge_index[0].astype(jnp.int32))
    dst = jnp.full((1, e_pad), -1, jnp.int32).at[0, :n_edges].set(edge_index[1].astype(jnp.int32))

    vmem_budget = 32 * 1024 * 1024      # fits v5e/v6e (128 MiB) and v7x (64 MiB)

    # ---- Stage 1: hoisted dense feature transforms (tiled over node blocks).
    xw_bf16, xselfb = pl.pallas_call(
        _feature_kernel,
        out_shape=(jax.ShapeDtypeStruct((n_pad, d_pad), jnp.bfloat16),
                   jax.ShapeDtypeStruct((n_pad, d_pad), jnp.float32)),
        grid_spec=pltpu.PrefetchScalarGridSpec(
            num_scalar_prefetch=0,
            grid=(n_pad // tn,),
            in_specs=[
                pl.BlockSpec((tn, din), lambda i: (i, 0)),
                pl.BlockSpec((din, d_pad), lambda i: (0, 0)),
                pl.BlockSpec((din, d_pad), lambda i: (0, 0)),
                pl.BlockSpec((1, d_pad), lambda i: (0, 0)),
            ],
            out_specs=[
                pl.BlockSpec((tn, d_pad), lambda i: (i, 0)),
                pl.BlockSpec((tn, d_pad), lambda i: (i, 0)),
            ],
        ),
        compiler_params=pltpu.CompilerParams(
            dimension_semantics=("parallel",),
            vmem_limit_bytes=vmem_budget,
        ),
    )(x_pad, w_pad, ws_pad, b_pad)

    # ---- Stage 2: edge aggregation (one-hot gather + scatter-add on the MXU).
    out_pad = pl.pallas_call(
        _aggregate_kernel,
        out_shape=jax.ShapeDtypeStruct((n_pad, d_pad), jnp.float32),
        grid_spec=pltpu.PrefetchScalarGridSpec(
            num_scalar_prefetch=0,
            grid=(n_pad // tn, e_pad // te),          # reduction (edge) axis last
            in_specs=[
                pl.BlockSpec((te, 1), lambda i, k: (k, 0)),          # src tile
                pl.BlockSpec((1, te), lambda i, k: (0, k)),          # dst tile (lane-major)
                pl.BlockSpec((n_pad, d_pad), lambda i, k: (0, 0)),   # x_w resident (bf16)
                pl.BlockSpec((tn, d_pad), lambda i, k: (i, 0)),      # x_self + bias tile
            ],
            out_specs=pl.BlockSpec((tn, d_pad), lambda i, k: (i, 0)),  # resident accumulator
        ),
        compiler_params=pltpu.CompilerParams(
            dimension_semantics=("parallel", "arbitrary"),
            vmem_limit_bytes=vmem_budget,
        ),
    )(src, dst, xw_bf16, xselfb)

    return out_pad[:n, :dout]


if __name__ == "__main__":
    # Small synthetic graph; chosen so the kernel runs a 2x2 (node, edge) grid.
    N = 100        # nodes  -> padded to 128 with block_n=64 (2 node tiles)
    E = 200        # edges  -> padded to 256 with block_e=128 (2 edge tiles)
    DIM_IN = 8
    DIM_OUT = 32

    key = jax.random.PRNGKey(0)
    kx, ke, kw, kws, kb = jax.random.split(key, 5)

    x = jax.random.normal(kx, (N, DIM_IN), dtype=jnp.float32)
    edge_index = jax.random.randint(ke, (2, E), 0, N, dtype=jnp.int32)

    glorot = (6.0 / (DIM_IN + DIM_OUT)) ** 0.5
    weight = jax.random.uniform(kw, (DIM_IN, DIM_OUT), jnp.float32, -glorot, glorot)
    weight_self = jax.random.uniform(kws, (DIM_IN, DIM_OUT), jnp.float32, -glorot, glorot)
    bias = 0.1 * jax.random.normal(kb, (DIM_OUT,), dtype=jnp.float32)

    out = egeneral_conv(x, edge_index, weight, weight_self, bias,
                        block_n=64, block_e=128)
    out = jax.block_until_ready(out)

    # Pure-JAX f32 reference (gather -> scatter-add -> self msg -> bias).
    xw_ref = x @ weight
    msg_ref = xw_ref[edge_index[0]]
    agg_ref = jnp.zeros((N, DIM_OUT), jnp.float32).at[edge_index[1]].add(msg_ref)
    ref = agg_ref + x @ weight_self + bias

    # Messages go through bf16 (x@W is cast to bf16 for the MXU gather), so the
    # check vs. the pure-f32 reference uses bf16-level tolerance; one-hots are
    # exact and all accumulation (plus the self path) stays f32.
    assert out.shape == (N, DIM_OUT)
    assert jnp.allclose(out, ref, atol=5e-2, rtol=5e-2), "mismatch vs JAX reference"
    print("KERNEL_OK")
</pallas_src>

<mosaic_0001>
module attributes {stable_mosaic.version = 11 : i64} {
  func.func @_feature_kernel(%arg0: i32, %arg1: memref<64x8xf32, #tpu.memory_space<vmem>>, %arg2: memref<8x128xf32, #tpu.memory_space<vmem>>, %arg3: memref<8x128xf32, #tpu.memory_space<vmem>>, %arg4: memref<1x128xf32, #tpu.memory_space<vmem>>, %arg5: memref<64x128xbf16, #tpu.memory_space<vmem>>, %arg6: memref<64x128xf32, #tpu.memory_space<vmem>>) attributes {dimension_semantics = [#tpu.dimension_semantics<parallel>], iteration_bounds = array<i64: 2>, scalar_prefetch = 0 : i64, scratch_operands = 0 : i64, tpu.core_type = #tpu.core_type<tc>, window_params = [{transform_indices = @transform_0, window_bounds = array<i64: 64, 8>}, {pipeline_mode = #tpu.pipeline_mode<synchronous>, transform_indices = @transform_1, window_bounds = array<i64: 8, 128>}, {pipeline_mode = #tpu.pipeline_mode<synchronous>, transform_indices = @transform_2, window_bounds = array<i64: 8, 128>}, {pipeline_mode = #tpu.pipeline_mode<synchronous>, transform_indices = @transform_3, window_bounds = array<i64: 1, 128>}, {transform_indices = @transform_4, window_bounds = array<i64: 64, 128>}, {transform_indices = @transform_5, window_bounds = array<i64: 64, 128>}]} {
    %c0 = arith.constant 0 : index
    %c0_0 = arith.constant 0 : index
    %0 = vector.load %arg1[%c0, %c0_0] : memref<64x8xf32, #tpu.memory_space<vmem>>, vector<64x8xf32>
    %c0_1 = arith.constant 0 : index
    %c0_2 = arith.constant 0 : index
    %1 = vector.load %arg2[%c0_1, %c0_2] : memref<8x128xf32, #tpu.memory_space<vmem>>, vector<8x128xf32>
    %cst = arith.constant dense<0.000000e+00> : vector<64x128xf32>
    %2 = tpu.matmul %0, %1, %cst {dimension_numbers = #tpu.dot_dimension_numbers<[1], [0], [0], [1], [0, 0, 1, 1], [], []>} : vector<64x8xf32>, vector<8x128xf32>, vector<64x128xf32> -> vector<64x128xf32>
    %c0_3 = arith.constant 0 : index
    %c0_4 = arith.constant 0 : index
    %3 = vector.load %arg3[%c0_3, %c0_4] : memref<8x128xf32, #tpu.memory_space<vmem>>, vector<8x128xf32>
    %cst_5 = arith.constant dense<0.000000e+00> : vector<64x128xf32>
    %4 = tpu.matmul %0, %3, %cst_5 {dimension_numbers = #tpu.dot_dimension_numbers<[1], [0], [0], [1], [0, 0, 1, 1], [], []>} : vector<64x8xf32>, vector<8x128xf32>, vector<64x128xf32> -> vector<64x128xf32>
    %5 = arith.truncf %2 : vector<64x128xf32> to vector<64x128xbf16>
    %c0_6 = arith.constant 0 : index
    %c0_7 = arith.constant 0 : index
    %6 = vector.load %arg5[%c0_6, %c0_7] : memref<64x128xbf16, #tpu.memory_space<vmem>>, vector<64x128xbf16>
    tpu.vector_store %arg5[%c0_6, %c0_7], %5 {strides = array<i32>} : memref<64x128xbf16, #tpu.memory_space<vmem>>, vector<64x128xbf16>,
    %c0_8 = arith.constant 0 : index
    %c0_9 = arith.constant 0 : index
    %7 = vector.load %arg4[%c0_8, %c0_9] : memref<1x128xf32, #tpu.memory_space<vmem>>, vector<1x128xf32>
    %8 = vector.broadcast %7 : vector<1x128xf32> to vector<64x128xf32>
    %9 = arith.addf %4, %8 : vector<64x128xf32>
    %c0_10 = arith.constant 0 : index
    %c0_11 = arith.constant 0 : index
    %10 = vector.load %arg6[%c0_10, %c0_11] : memref<64x128xf32, #tpu.memory_space<vmem>>, vector<64x128xf32>
    tpu.vector_store %arg6[%c0_10, %c0_11], %9 {strides = array<i32>} : memref<64x128xf32, #tpu.memory_space<vmem>>, vector<64x128xf32>,
    return
  }
  func.func @transform_0(%arg0: i32) -> (i32, i32) {
    %c0_i32 = arith.constant 0 : i32
    %c0_i32_0 = arith.constant 0 : i32
    return %arg0, %c0_i32 : i32, i32
  }
  func.func @transform_1(%arg0: i32) -> (i32, i32) {
    %c0_i32 = arith.constant 0 : i32
    %c0_i32_0 = arith.constant 0 : i32
    %c0_i32_1 = arith.constant 0 : i32
    return %c0_i32, %c0_i32_0 : i32, i32
  }
  func.func @transform_2(%arg0: i32) -> (i32, i32) {
    %c0_i32 = arith.constant 0 : i32
    %c0_i32_0 = arith.constant 0 : i32
    %c0_i32_1 = arith.constant 0 : i32
    return %c0_i32, %c0_i32_0 : i32, i32
  }
  func.func @transform_3(%arg0: i32) -> (i32, i32) {
    %c0_i32 = arith.constant 0 : i32
    %c0_i32_0 = arith.constant 0 : i32
    %c0_i32_1 = arith.constant 0 : i32
    return %c0_i32, %c0_i32_0 : i32, i32
  }
  func.func @transform_4(%arg0: i32) -> (i32, i32) {
    %c0_i32 = arith.constant 0 : i32
    %c0_i32_0 = arith.constant 0 : i32
    return %arg0, %c0_i32 : i32, i32
  }
  func.func @transform_5(%arg0: i32) -> (i32, i32) {
    %c0_i32 = arith.constant 0 : i32
    %c0_i32_0 = arith.constant 0 : i32
    return %arg0, %c0_i32 : i32, i32
  }
}

</mosaic_0001>

<bundles_post_ra>
// kernel: tpu_custom_call.1
= control target key start
LH: loop header
LB: loop body
LE: loop exit
PB: predicated region body
PF: predicated region fallthrough
CT: control target
= control target key end

     0   :  { %11 = vsyncpa [#allocation3], 0  ;;  %s1142_s0 = inlined_call_operand.vmem [shape: f32[128,8], index: 0, kind: input, shape index: {}]   ;;  %s1143_s1 = inlined_call_operand.vmem [shape: f32[8,128], index: 1, kind: input, shape index: {}]   ;;  %s1144_s2 = inlined_call_operand.vmem [shape: f32[8,128], index: 2, kind: input, shape index: {}]   ;;  %s1145_s3 = inlined_call_operand.vmem [shape: f32[1,128], index: 3, kind: input, shape index: {}]   ;;  %s1146_s4 = inlined_call_operand.hbm [shape: bf16[128,128], index: 4, kind: output, shape index: {0}]   ;;  %s1147_s5 = inlined_call_operand.hbm [shape: f32[128,128], index: 5, kind: output, shape index: {1}]  }
   0x1   :  { %13 = vsyncpa [#allocation3 + $0x1], 0 }
   0x2   :  { %14 = vsyncpa [#allocation5], 0 }
   0x3   :  { %16 = vsyncpa [#allocation5 + $0x1], 0  ;;  %s963_s18 = smov 0   ;;  %s965_s19 = smov 0  }
   0x4   :  { %s967_s20 = smov 0   ;;  %s969_s21 = smov 0  }
   0x5 LB: > { %s984_s22 = sadd.s32 4294967295, %s925_s21   ;;  %s667_s23 = sadd.s32 4294967294, %s925_s21   ;;  %s925_s21 = sphi %s969_s21, %s1153_s21   ;;  %s921_s20 = sphi %s967_s20, %s1152_s20   ;;  %s917_s19 = sphi %s965_s19, %s1151_s19   ;;  %s913_s18 = sphi %s963_s18, %s1150_s18  }
   0x6   : > { %s988_s24 = sadd.s32 1, %s925_s21   ;;  %s118_s25 = sadd.s32 1, %s921_s20 }
   0x7   : > { %s115_s26 = ssub.s32 %s925_s21, %s988_s24  ;;  %p128_p0 = scmp.ne.s32.totalorder %s921_s20, %s917_s19 }
   0x8   : > { %p116_p1 = scmp.eq.s32.totalorder %s115_s26, 0  ;;  %p129_p2 = scmp.eq.s32.totalorder %s984_s22, 1 }
   0x9   : > { %p134_p3 = scmp.ne.s32.totalorder %s917_s19, %s913_s18  ;;  %p135_p4 = scmp.eq.s32.totalorder %s667_s23, 1 }
   0xa   : > { %s999_s27 = scalar_select %p116_p1, %s921_s20, %s118_s25  }
   0xb   : > { %p1001_p5 = por %p129_p2, %p128_p0  ;;  %p1005_p6 = por %p135_p4, %p134_p3 }
   0xc   : > { %p670_p7 = scmp.ge.s32.totalorder %s925_s21, 1  ;;  %p197_p8 = scmp.lt.s32.totalorder %s925_s21, 3 }
   0xe   : > { %p198_p9 = pnand %p670_p7, %p197_p8 }
   0xf   : > { %s673_s9 = sshll.u32 (!%p198_p9), %s984_s22, 3  ;;  %s1038_s14 = sand.u32 (!%p198_p9), 1, %s917_s19  }
  0x10   : > { %201 = sbr.rel (%p198_p9) target bundleno = 272 (0x110), region = 36  ;;  %p231_p10 = scmp.lt.s32.totalorder (!%p198_p9), %s673_s9, 15 }
  0x11   : > { %s672_s15 = sshll.u32 (!%p198_p9), %s1038_s14, 6  ;;  %s671_s23 = sshll.u32 (!%p198_p9), %s1038_s14, 5 }
  0x12   : > { %s1045_s25 = scalar_lea.vmem (!%p198_p9), [#allocation4], %s672_s15  ;;  %s1048_s26 = scalar_lea.vmem (!%p198_p9), [#allocation2], %s671_s23 }
  0x13   : > { %s557_s30 = sshll.u32 (!%p198_p9), %s1048_s26, 4  ;;  %s716_s6 = sshll.u32 (!%p198_p9), %s984_s22, 9  ;;  %s1057_s30 = int_to_ptr.vmem [resolvable:$true] %s557_s30 }
  0x14   : > { %s717_s7 = sshll.u32 (!%p198_p9), %s984_s22, 10  ;;  %s573_s8 = sshll.u32 (!%p198_p9), %s1045_s25, 4  ;;  %s1075_s8 = int_to_ptr.vmem [resolvable:$true] %s573_s8 }
  0x15   : > { %v246_v0 = vld [vmem:[%s1143_s1] sm:$0xff]  ;;  %s1155_s9 = smov (!%p231_p10, %s673_s9), 15  ;;  %vm247_vm0 = vcmask 64512   ;;  %s1067_s11 = scalar_lea.hbm %s1146_s4, %s716_s6 }
  0x16   : > { %v377_v1 = vld [vmem:[%s1144_s2] sm:$0xff]  ;;  %759 = vmatprep.subr.mxu0 %v246_v0  ;;  %s674_s10 = sshll.u32 %s1155_s9, 3  ;;  %s539_s15 = scalar_lea.sflag [#allocation3], %s1038_s14 }
  0x17   : > { %773 = vmatprep.subr.mxu1 %v377_v1  ;;  %760 = vmatpush3.msra.mxu0 %v246_v0  ;;  %s234_s13 = scalar_lea.vmem %s1142_s0, %s674_s10  ;;  %v691_v10 = vld [vmem:[%s1145_s3] ss:$0 sm:$0xff]  ;;  %s835_s16 = scalar_lea.vmem %s1057_s30, 512 }
  0x18   : > { %774 = vmatpush3.msra.mxu1 %v377_v1  ;;  %v238_v2 = vld [vmem:[%s234_s13] sm:$0xff]  ;;  %v239_v3 = vld [vmem:[%s234_s13 + $0x8] sm:$0xff]  ;;  %v240_v4 = vld [vmem:[%s234_s13 + $0x10] sm:$0xff]  ;;  %p836_p11 = scmp.ne.s32.totalorder %s1057_s30, %s835_s16  ;;  %s927_s17 = smov [#allocation2]  }
  0x19   : > { %761 = vmatprep.mubr.msk.f32.mxu0 %vm247_vm0, %v238_v2  ;;  %775 = vmatprep.mubr.msk.f32.mxu1 %vm247_vm0, %v238_v2  ;;  %v241_v5 = vld [vmem:[%s234_s13 + $0x18] sm:$0xff]  ;;  %v242_v6 = vld [vmem:[%s234_s13 + $0x20] sm:$0xff]  ;;  %v243_v7 = vld [vmem:[%s234_s13 + $0x28] sm:$0xff]  ;;  %s839_s23 = sshll.u32 %s927_s17, 4  ;;  %s840_s23 = int_to_ptr.vmem [resolvable:$false] %s839_s23 }
  0x1a   : > { %762 = vmatmul.mubr.msk.f32.vlgmr.msra.gmra.mxu0 %vm247_vm0, %v239_v3  ;;  %776 = vmatmul.mubr.msk.f32.vlgmr.msra.gmra.mxu1 %vm247_vm0, %v239_v3  ;;  %v244_v8 = vld [vmem:[%s234_s13 + $0x30] sm:$0xff]  ;;  %v245_v9 = vld [vmem:[%s234_s13 + $0x38] sm:$0xff]  ;;  %s1073_s13 = scalar_lea.hbm %s1147_s5, %s717_s7  ;;  %p837_p12 = pnand %p836_p11, %p1001_p5 }
  0x1b   : > { %764 = vmatprep.mubr.msk.f32.mxu0 %vm247_vm0, %v240_v4  ;;  %778 = vmatprep.mubr.msk.f32.mxu1 %vm247_vm0, %v240_v4  ;;  %s841_s6 = scalar_lea.vmem %s840_s23, 1024  ;;  %p842_p0 = scmp.lt.s32.totalorder %s1057_s30, %s840_s23 }
  0x1c   : > { %p838_p13 = pneg %p837_p12  ;;  %p843_p1 = scmp.lt.s32.totalorder %s841_s6, %s835_s16 }
  0x1e   : > { %765 = vmatmul.mubr.msk.f32.gmra.mxu0 %vm247_vm0, %v241_v5  ;;  %779 = vmatmul.mubr.msk.f32.gmra.mxu1 %vm247_vm0, %v241_v5  ;;  %p844_p2 = por %p843_p1, %p842_p0 }
  0x1f   : > { %767 = vmatprep.mubr.msk.f32.mxu0 %vm247_vm0, %v242_v6  ;;  %781 = vmatprep.mubr.msk.f32.mxu1 %vm247_vm0, %v242_v6 }
  0x20   : > { %p845_p3 = pnand %p844_p2, %p838_p13 }
  0x22   : > { %768 = vmatmul.mubr.msk.f32.gmra.mxu0 %vm247_vm0, %v243_v7  ;;  %782 = vmatmul.mubr.msk.f32.gmra.mxu1 %vm247_vm0, %v243_v7 }
  0x23   : > { %770 = vmatprep.mubr.msk.f32.mxu0 %vm247_vm0, %v244_v8  ;;  %784 = vmatprep.mubr.msk.f32.mxu1 %vm247_vm0, %v244_v8 }
  0x26   : > { %771 = vmatmul.mubr.msk.f32.gmra.mxu0 %vm247_vm0, %v245_v9  ;;  %785 = vmatmul.mubr.msk.f32.gmra.mxu1 %vm247_vm0, %v245_v9 }
  0xda   : > { %v763_v11 = vpop.f32.mrf.mxu0  ;;  %v777_v12 = vpop.f32.mrf.mxu1 }
  0xdb   : > { %v497_v13 = vadd.f32 %v777_v12, %v691_v10 }
  0xdc   : > { %v338_v14 = vpop.f32.mrf.mxu0  ;;  %v491_v15 = vpop.f32.mrf.mxu1 }
  0xdd   : > { %531 = vst [vmem:[%s1045_s25 + $0x8] sm:$0xff] %v497_v13  ;;  %v721_v16 = vpack.c.bf16 %v763_v11, %v338_v14  ;;  %v492_v17 = vadd.f32 %v691_v10, %v491_v15 }
  0xde   : > { %v766_v18 = vpop.f32.mrf.mxu0  ;;  %v780_v19 = vpop.f32.mrf.mxu1 }
  0xdf   : > { %722 = vst [vmem:[%s1048_s26] sm:$0xff] %v721_v16   ;;  %530 = vst [vmem:[%s1045_s25] sm:$0xff] %v492_v17  ;;  %v507_v20 = vadd.f32 %v780_v19, %v691_v10 }
  0xe0   : > { %v348_v21 = vpop.f32.mrf.mxu0  ;;  %v501_v22 = vpop.f32.mrf.mxu1 }
  0xe1   : > { %533 = vst [vmem:[%s1045_s25 + $0x18] sm:$0xff] %v507_v20  ;;  %v726_v23 = vpack.c.bf16 %v766_v18, %v348_v21  ;;  %v502_v24 = vadd.f32 %v691_v10, %v501_v22 }
  0xe2   : > { %v769_v25 = vpop.f32.mrf.mxu0  ;;  %v783_v26 = vpop.f32.mrf.mxu1 }
  0xe3   : > { %738 = vst [vmem:[%s1048_s26 + $0x8] sm:$0xff] %v726_v23   ;;  %532 = vst [vmem:[%s1045_s25 + $0x10] sm:$0xff] %v502_v24  ;;  %v517_v27 = vadd.f32 %v783_v26, %v691_v10 }
  0xe4   : > { %v358_v28 = vpop.f32.mrf.mxu0  ;;  %v511_v29 = vpop.f32.mrf.mxu1 }
  0xe5   : > { %535 = vst [vmem:[%s1045_s25 + $0x28] sm:$0xff] %v517_v27  ;;  %v731_v30 = vpack.c.bf16 %v769_v25, %v358_v28  ;;  %v512_v31 = vadd.f32 %v691_v10, %v511_v29 }
  0xe6   : > { %v772_v32 = vpop.f32.mrf.mxu0  ;;  %v786_v33 = vpop.f32.mrf.mxu1 }
  0xe7   : > { %739 = vst [vmem:[%s1048_s26 + $0x10] sm:$0xff] %v731_v30   ;;  %534 = vst [vmem:[%s1045_s25 + $0x20] sm:$0xff] %v512_v31  ;;  %v527_v34 = vadd.f32 %v786_v33, %v691_v10 }
  0xe8   : > { %v368_v35 = vpop.f32.mrf.mxu0  ;;  %v521_v36 = vpop.f32.mrf.mxu1 }
  0xe9   : > { %537 = vst [vmem:[%s1045_s25 + $0x38] sm:$0xff] %v527_v34  ;;  %v736_v37 = vpack.c.bf16 %v772_v32, %v368_v35  ;;  %v522_v38 = vadd.f32 %v691_v10, %v521_v36 }
  0xeb   : > { %740 = vst [vmem:[%s1048_s26 + $0x18] sm:$0xff] %v736_v37   ;;  %536 = vst [vmem:[%s1045_s25 + $0x30] sm:$0xff] %v522_v38 }
  0xec   : > { %848 = shalt.err (!%p845_p3)
}
  0xed   : > { %s849_s25 = scalar_lea.hbm %s1067_s11, 512  ;;  %s853_s9 = scalar_lea.hbm %s1146_s4, 1024 }
  0xee   : > { %p850_p4 = scmp.ne.s32.totalorder %s1067_s11, %s849_s25  ;;  %p854_p9 = scmp.lt.s32.totalorder %s1067_s11, %s1146_s4 }
  0xef   : > { %p855_p10 = scmp.lt.s32.totalorder %s853_s9, %s849_s25 }
  0xf0   : > { %p851_p7 = pnand %p850_p4, %p1001_p5 }
  0xf1   : > { %p856_p11 = por %p855_p10, %p854_p9 }
  0xf2   : > { %p852_p8 = pneg %p851_p7 }
  0xf4   : > { %p857_p12 = pnand %p856_p11, %p852_p8 }
  0xf6   : > { %860 = shalt.err (!%p857_p12)
}
  0xf7   : > { %s928_s22 = smov 64   ;;  %s929_s16 = smov 4  }
  0xf8   : > { %787 = dma.vmem_to_hbm [thread:$0]  (%p1001_p5), %s1057_s30, 512, %s1067_s11, %s539_s15, %s928_s22, %s928_s22, %s929_s16  }
  0xf9   : > { %s544_s17 = scalar_lea.sflag [#allocation5], %s1038_s14  ;;  %s861_s23 = scalar_lea.vmem %s1075_s8, 1024 }
  0xfa   : > { %p862_p13 = scmp.ne.s32.totalorder %s1075_s8, %s861_s23  ;;  %s930_s6 = smov [#allocation4]  }
  0xfb   : > { %s865_s25 = sshll.u32 %s930_s6, 4  ;;  %s866_s25 = int_to_ptr.vmem [resolvable:$false] %s865_s25 }
  0xfc   : > { %p863_p0 = pnand %p862_p13, %p1001_p5  ;;  %s867_s26 = scalar_lea.vmem %s866_s25, 2048 }
  0xfd   : > { %p868_p2 = scmp.lt.s32.totalorder %s1075_s8, %s866_s25  ;;  %p869_p3 = scmp.lt.s32.totalorder %s867_s26, %s861_s23 }
  0xfe   : > { %p864_p1 = pneg %p863_p0 }
  0xff   : > { %p870_p4 = por %p869_p3, %p868_p2 }
 0x101   : > { %p871_p7 = pnand %p870_p4, %p864_p1 }
 0x103   : > { %874 = shalt.err (!%p871_p7)
}
 0x104   : > { %s875_s30 = scalar_lea.hbm %s1073_s13, 1024  ;;  %s879_s7 = scalar_lea.hbm %s1147_s5, 2048 }
 0x105   : > { %p876_p8 = scmp.ne.s32.totalorder %s1073_s13, %s875_s30  ;;  %p880_p11 = scmp.lt.s32.totalorder %s1073_s13, %s1147_s5 }
 0x106   : > { %p881_p12 = scmp.lt.s32.totalorder %s879_s7, %s875_s30 }
 0x107   : > { %p877_p9 = pnand %p876_p8, %p1001_p5 }
 0x108   : > { %p882_p13 = por %p881_p12, %p880_p11 }
 0x109   : > { %p878_p10 = pneg %p877_p9 }
 0x10b   : > { %p883_p0 = pnand %p882_p13, %p878_p10 }
 0x10d   : > { %886 = shalt.err (!%p883_p0)
}
 0x10e   : > { %s931_s12 = smov 128   ;;  %s932_s22 = smov 8  }
 0x10f   : > { %788 = dma.vmem_to_hbm [thread:$0]  (%p1001_p5), %s1075_s8, 1024, %s1073_s13, %s544_s17, %s931_s12, %s931_s12, %s932_s22  }
 0x110 PF: > { %p798_p1 = scmp.ge.s32.totalorder %s925_s21, 2  ;;  %s588_s16 = sand.u32 1, %s913_s18  }
 0x111   : > { %s589_s23 = scalar_lea.sflag [#allocation3], %s588_s16 }
 0x112   : > { %p792_p2 = pnand %p798_p1, %p1005_p6 }
 0x114   : > { %p793_p3 = pneg %p792_p2 }
 0x116   : > { %904 = dma.done.wait (%p793_p3), %s589_s23, 512  }
 0x117   : > { %906 = vsyncadd (%p793_p3), %s589_s23, 4294966784  ;;  %s598_s6 = scalar_lea.sflag [#allocation5], %s588_s16 }
 0x118   : > { %908 = dma.done.wait (%p793_p3), %s598_s6, 1024  }
 0x119   : > { %910 = vsyncadd (%p793_p3), %s598_s6, 4294966272  ;;  %p19_p5 = scmp.ge.s32.totalorder %s988_s24, 4   ;;  %s1150_s18 = smov %s917_s19 }
 0x11a   : > { %s1151_s19 = smov %s921_s20  ;;  %s1152_s20 = smov %s999_s27 }
 0x11b   : > { %s1153_s21 = smov %s988_s24  ;;  %21 = sbr.rel (!%p19_p5) target bundleno = 5 (0x5), region = 88 }
 0x120   :  { %603 = vsyncpa [#allocation3], 1 }
 0x121   :  { %605 = vsyncpa [#allocation3 + $0x1], 1 }
 0x122   :  { %606 = vsyncpa [#allocation5], 1 }
 0x123   :  { %608 = vsyncpa [#allocation5 + $0x1], 1 }

</bundles_post_ra>
